<compile_context>
chip_gen: v7x
topology: tpu7x:2x2x1
jax: 0.10.0
libtpu: 0.0.40
codegen_flags: <defaults>
</compile_context>

<pallas_src>
import functools

import jax
import jax.numpy as jnp
from jax.experimental import pallas as pl
from jax.experimental.pallas import tpu as pltpu


def _round_up(n, m):
    return ((n + m - 1) // m) * m


def _mlp_kernel(x_ref, w1_ref, b1_ref, w2_ref, b2_ref, w3_ref, b3_ref, o_ref,
                *, dot_dtype):
    x = x_ref[...]
    if dot_dtype is not None:
        x = x.astype(dot_dtype)

    # Layer 1: x @ W1 + b1, ReLU  (f32 MXU accumulation; bias/ReLU in f32).
    h = jnp.dot(x, w1_ref[...], preferred_element_type=jnp.float32)
    h = jnp.maximum(h + b1_ref[...], 0.0)
    if dot_dtype is not None:
        h = h.astype(dot_dtype)

    # Layer 2: h @ W2 + b2, ReLU
    h = jnp.dot(h, w2_ref[...], preferred_element_type=jnp.float32)
    h = jnp.maximum(h + b2_ref[...], 0.0)
    if dot_dtype is not None:
        h = h.astype(dot_dtype)

    # Layer 3: h @ W3 + b3 (no activation)
    out = jnp.dot(h, w3_ref[...], preferred_element_type=jnp.float32)
    o_ref[...] = (out + b3_ref[...]).astype(o_ref.dtype)


def _vmem_cap_bytes():
    """Per-core VMEM capacity minus headroom for compiler-internal scratch."""
    try:
        cap = int(pltpu.get_tpu_info().vmem_capacity_bytes)
    except Exception:
        cap = 64 * 1024 * 1024          # conservative (v7x-sized) fallback
    return max(cap - 12 * 1024 * 1024, 16 * 1024 * 1024)


def nn_relu_forward(x, params, *, batch_tile=512, dot_dtype=None):
    """Fused 3-layer MLP forward pass as a single Pallas kernel.

    x: (B, D_in) float32
    params: dict with w1 (D_in,H1), b1 (1,H1), w2 (H1,H2), b2 (1,H2),
            w3 (H2,D_out), b3 (1,D_out)
    batch_tile: target rows per grid step (auto-clamped to fit VMEM / keep
                enough grid steps for pipelining + megacore).
    dot_dtype: optional narrower dtype (e.g. jnp.bfloat16) for the matmul
               operands; accumulation stays f32.
    """
    w1, b1 = params["w1"], params["b1"]
    w2, b2 = params["w2"], params["b2"]
    w3, b3 = params["w3"], params["b3"]

    B, D_in = x.shape
    H1, H2, D_out = w1.shape[1], w2.shape[1], w3.shape[1]

    if dot_dtype is not None:
        # Cast weights once in the wrapper: halves resident VMEM + weight DMA.
        w1, w2, w3 = (w.astype(dot_dtype) for w in (w1, w2, w3))
    b1 = b1.astype(jnp.float32)
    b2 = b2.astype(jnp.float32)
    b3 = b3.astype(jnp.float32)

    x_item = jnp.dtype(x.dtype).itemsize
    w_item = jnp.dtype(w1.dtype).itemsize
    # bf16 operands pack two rows per sublane -> tile rows multiple of 16.
    row_mult = 16 if w_item < 4 else 8

    vmem_cap = _vmem_cap_bytes()

    def vmem_need(tb):
        # x/out tiles double-buffered by the pipeline; weights budgeted with 2
        # buffers (worst case, if Buffered(1) is unavailable); live f32
        # intermediates; 25% slack for Mosaic internal layout padding.
        n = (2 * tb * D_in * x_item
             + 2 * tb * D_out * x_item
             + 2 * ((D_in * H1 + H1 * H2 + H2 * D_out) * w_item
                    + (H1 + H2 + D_out) * 4)
             + tb * (H1 + H2) * 4)
        return int(1.25 * n) + (2 << 20)

    # Batch tile: big enough to amortize the ~0.35us/step grid overhead, small
    # enough to keep >=4 grid steps when the batch is large and to fit VMEM.
    tb = max(row_mult,
             min(_round_up(batch_tile, row_mult), _round_up(B, row_mult)))
    if B >= 4 * 128:
        tb = min(tb, _round_up(pl.cdiv(B, 4), row_mult))
    while tb > row_mult and vmem_need(tb) > vmem_cap:
        tb = max(row_mult, _round_up(tb // 2, row_mult))

    B_p = _round_up(B, tb)              # ragged batch -> pad rows only
    grid = (B_p // tb,)
    x_p = x if B_p == B else jnp.pad(x, ((0, B_p - B), (0, 0)))

    vmem_limit = int(min(max(vmem_need(tb), 32 * 1024 * 1024), vmem_cap))

    cost = pl.CostEstimate(
        flops=2 * B_p * (D_in * H1 + H1 * H2 + H2 * D_out),
        transcendentals=0,
        bytes_accessed=(B_p * (D_in + D_out) * x_item
                        + (D_in * H1 + H1 * H2 + H2 * D_out) * w_item
                        + (H1 + H2 + D_out) * 4),
    )

    kernel = functools.partial(_mlp_kernel, dot_dtype=dot_dtype)

    def build(weight_buffers):
        if weight_buffers == 1:
            def const_spec(shape):
                return pl.BlockSpec(shape, lambda i: (0, 0),
                                    pipeline_mode=pl.Buffered(1))
        else:
            def const_spec(shape):
                return pl.BlockSpec(shape, lambda i: (0, 0))
        return pl.pallas_call(
            kernel,
            out_shape=jax.ShapeDtypeStruct((B_p, D_out), x.dtype),
            grid=grid,
            in_specs=[
                pl.BlockSpec((tb, D_in), lambda i: (i, 0)),   # x: streamed tile
                const_spec((D_in, H1)),                       # W1 (resident)
                const_spec((1, H1)),                          # b1
                const_spec((H1, H2)),                         # W2
                const_spec((1, H2)),                          # b2
                const_spec((H2, D_out)),                      # W3
                const_spec((1, D_out)),                       # b3
            ],
            out_specs=pl.BlockSpec((tb, D_out), lambda i: (i, 0)),
            compiler_params=pltpu.CompilerParams(
                # Batch tiles are independent -> megacore sharding on v7x.
                dimension_semantics=("parallel",),
                vmem_limit_bytes=vmem_limit,
            ),
            cost_estimate=cost,
        )

    args = (x_p, w1, b1, w2, b2, w3, b3)
    try:
        # Constant-index operands are fetched once; single-buffering halves
        # their resident VMEM (matters most on v7x's 64 MiB).
        out_p = build(1)(*args)
    except Exception:
        out_p = build(2)(*args)

    return out_p if B_p == B else out_p[:B]


def init_params(key, D_in, H1, H2, D_out, dtype=jnp.float32):
    """Deterministic parameter init (Kaiming-uniform-ish, like nn.Linear defaults)."""
    def linear_init(k, fan_in, fan_out):
        kw, kb = jax.random.split(k)
        bound = 1.0 / jnp.sqrt(fan_in)
        # Stored as (in, out): equivalent to PyTorch (out, in) transposed.
        w = jax.random.uniform(kw, (fan_in, fan_out), dtype, -bound, bound)
        b = jax.random.uniform(kb, (1, fan_out), dtype, -bound, bound)
        return w, b

    k1, k2, k3 = jax.random.split(key, 3)
    w1, b1 = linear_init(k1, D_in, H1)
    w2, b2 = linear_init(k2, H1, H2)
    w3, b3 = linear_init(k3, H2, D_out)
    return {"w1": w1, "b1": b1, "w2": w2, "b2": b2, "w3": w3, "b3": b3}


def _reference(x, p):
    h1 = jnp.maximum(x @ p["w1"] + p["b1"], 0.0)
    h2 = jnp.maximum(h1 @ p["w2"] + p["b2"], 0.0)
    return h2 @ p["w3"] + p["b3"]


if __name__ == "__main__":
    # Small shapes consistent with the module's (D_in, H1, H2, D_out) MLP.
    D_in, H1, H2, D_out = 32, 64, 64, 16
    key = jax.random.PRNGKey(0)
    kx, kp = jax.random.split(key)
    params = init_params(kp, D_in, H1, H2, D_out)

    # B=512 -> tile auto-derives to 128 rows => grid=(4,), pipelined / megacore.
    B = 512
    x = jax.random.normal(kx, (B, D_in), dtype=jnp.float32)
    out = jax.block_until_ready(nn_relu_forward(x, params))
    ref = _reference(x, params)
    assert out.shape == (B, D_out)
    assert jnp.allclose(out, ref, atol=1e-5, rtol=1e-5)

    # Ragged batch (not a multiple of the tile): row padding + slice.
    B2 = 100
    x2 = jax.random.normal(kx, (B2, D_in), dtype=jnp.float32)
    out2 = jax.block_until_ready(nn_relu_forward(x2, params, batch_tile=64))
    ref2 = _reference(x2, params)
    assert out2.shape == (B2, D_out)
    assert jnp.allclose(out2, ref2, atol=1e-5, rtol=1e-5)

    # Optional bf16-operand path (f32 accumulation): looser tolerance expected.
    out3 = jax.block_until_ready(
        nn_relu_forward(x, params, dot_dtype=jnp.bfloat16))
    assert out3.shape == (B, D_out)
    assert jnp.allclose(out3, ref, atol=5e-2, rtol=5e-2)

    print("KERNEL_OK")
</pallas_src>

<mosaic_0001>
module attributes {stable_mosaic.version = 11 : i64} {
  func.func @_mlp_kernel(%arg0: i32, %arg1: memref<128x32xf32, #tpu.memory_space<vmem>>, %arg2: memref<32x64xf32, #tpu.memory_space<vmem>>, %arg3: memref<1x64xf32, #tpu.memory_space<vmem>>, %arg4: memref<64x64xf32, #tpu.memory_space<vmem>>, %arg5: memref<1x64xf32, #tpu.memory_space<vmem>>, %arg6: memref<64x16xf32, #tpu.memory_space<vmem>>, %arg7: memref<1x16xf32, #tpu.memory_space<vmem>>, %arg8: memref<128x16xf32, #tpu.memory_space<vmem>>) attributes {dimension_semantics = [#tpu.dimension_semantics<parallel>], iteration_bounds = array<i64: 4>, scalar_prefetch = 0 : i64, scratch_operands = 0 : i64, tpu.core_type = #tpu.core_type<tc>, window_params = [{transform_indices = @transform_0, window_bounds = array<i64: 128, 32>}, {pipeline_mode = #tpu.pipeline_mode<synchronous>, transform_indices = @transform_1, window_bounds = array<i64: 32, 64>}, {pipeline_mode = #tpu.pipeline_mode<synchronous>, transform_indices = @transform_2, window_bounds = array<i64: 1, 64>}, {pipeline_mode = #tpu.pipeline_mode<synchronous>, transform_indices = @transform_3, window_bounds = array<i64: 64, 64>}, {pipeline_mode = #tpu.pipeline_mode<synchronous>, transform_indices = @transform_4, window_bounds = array<i64: 1, 64>}, {pipeline_mode = #tpu.pipeline_mode<synchronous>, transform_indices = @transform_5, window_bounds = array<i64: 64, 16>}, {pipeline_mode = #tpu.pipeline_mode<synchronous>, transform_indices = @transform_6, window_bounds = array<i64: 1, 16>}, {transform_indices = @transform_7, window_bounds = array<i64: 128, 16>}]} {
    %c0 = arith.constant 0 : index
    %c0_0 = arith.constant 0 : index
    %0 = vector.load %arg1[%c0, %c0_0] : memref<128x32xf32, #tpu.memory_space<vmem>>, vector<128x32xf32>
    %c0_1 = arith.constant 0 : index
    %c0_2 = arith.constant 0 : index
    %1 = vector.load %arg2[%c0_1, %c0_2] : memref<32x64xf32, #tpu.memory_space<vmem>>, vector<32x64xf32>
    %cst = arith.constant dense<0.000000e+00> : vector<128x64xf32>
    %2 = tpu.matmul %0, %1, %cst {dimension_numbers = #tpu.dot_dimension_numbers<[1], [0], [0], [1], [0, 0, 1, 1], [], []>} : vector<128x32xf32>, vector<32x64xf32>, vector<128x64xf32> -> vector<128x64xf32>
    %c0_3 = arith.constant 0 : index
    %c0_4 = arith.constant 0 : index
    %3 = vector.load %arg3[%c0_3, %c0_4] : memref<1x64xf32, #tpu.memory_space<vmem>>, vector<1x64xf32>
    %4 = vector.broadcast %3 : vector<1x64xf32> to vector<128x64xf32>
    %5 = arith.addf %2, %4 : vector<128x64xf32>
    %cst_5 = arith.constant 0.000000e+00 : f32
    %6 = vector.broadcast %cst_5 : f32 to vector<128x64xf32>
    %7 = arith.maximumf %5, %6 : vector<128x64xf32>
    %c0_6 = arith.constant 0 : index
    %c0_7 = arith.constant 0 : index
    %8 = vector.load %arg4[%c0_6, %c0_7] : memref<64x64xf32, #tpu.memory_space<vmem>>, vector<64x64xf32>
    %cst_8 = arith.constant dense<0.000000e+00> : vector<128x64xf32>
    %9 = tpu.matmul %7, %8, %cst_8 {dimension_numbers = #tpu.dot_dimension_numbers<[1], [0], [0], [1], [0, 0, 1, 1], [], []>} : vector<128x64xf32>, vector<64x64xf32>, vector<128x64xf32> -> vector<128x64xf32>
    %c0_9 = arith.constant 0 : index
    %c0_10 = arith.constant 0 : index
    %10 = vector.load %arg5[%c0_9, %c0_10] : memref<1x64xf32, #tpu.memory_space<vmem>>, vector<1x64xf32>
    %11 = vector.broadcast %10 : vector<1x64xf32> to vector<128x64xf32>
    %12 = arith.addf %9, %11 : vector<128x64xf32>
    %cst_11 = arith.constant 0.000000e+00 : f32
    %13 = vector.broadcast %cst_11 : f32 to vector<128x64xf32>
    %14 = arith.maximumf %12, %13 : vector<128x64xf32>
    %c0_12 = arith.constant 0 : index
    %c0_13 = arith.constant 0 : index
    %15 = vector.load %arg6[%c0_12, %c0_13] : memref<64x16xf32, #tpu.memory_space<vmem>>, vector<64x16xf32>
    %cst_14 = arith.constant dense<0.000000e+00> : vector<128x16xf32>
    %16 = tpu.matmul %14, %15, %cst_14 {dimension_numbers = #tpu.dot_dimension_numbers<[1], [0], [0], [1], [0, 0, 1, 1], [], []>} : vector<128x64xf32>, vector<64x16xf32>, vector<128x16xf32> -> vector<128x16xf32>
    %c0_15 = arith.constant 0 : index
    %c0_16 = arith.constant 0 : index
    %17 = vector.load %arg7[%c0_15, %c0_16] : memref<1x16xf32, #tpu.memory_space<vmem>>, vector<1x16xf32>
    %18 = vector.broadcast %17 : vector<1x16xf32> to vector<128x16xf32>
    %19 = arith.addf %16, %18 : vector<128x16xf32>
    %c0_17 = arith.constant 0 : index
    %c0_18 = arith.constant 0 : index
    %20 = vector.load %arg8[%c0_17, %c0_18] : memref<128x16xf32, #tpu.memory_space<vmem>>, vector<128x16xf32>
    tpu.vector_store %arg8[%c0_17, %c0_18], %19 {strides = array<i32>} : memref<128x16xf32, #tpu.memory_space<vmem>>, vector<128x16xf32>,
    return
  }
  func.func @transform_0(%arg0: i32) -> (i32, i32) {
    %c0_i32 = arith.constant 0 : i32
    %c0_i32_0 = arith.constant 0 : i32
    return %arg0, %c0_i32 : i32, i32
  }
  func.func @transform_1(%arg0: i32) -> (i32, i32) {
    %c0_i32 = arith.constant 0 : i32
    %c0_i32_0 = arith.constant 0 : i32
    %c0_i32_1 = arith.constant 0 : i32
    return %c0_i32, %c0_i32_0 : i32, i32
  }
  func.func @transform_2(%arg0: i32) -> (i32, i32) {
    %c0_i32 = arith.constant 0 : i32
    %c0_i32_0 = arith.constant 0 : i32
    %c0_i32_1 = arith.constant 0 : i32
    return %c0_i32, %c0_i32_0 : i32, i32
  }
  func.func @transform_3(%arg0: i32) -> (i32, i32) {
    %c0_i32 = arith.constant 0 : i32
    %c0_i32_0 = arith.constant 0 : i32
    %c0_i32_1 = arith.constant 0 : i32
    return %c0_i32, %c0_i32_0 : i32, i32
  }
  func.func @transform_4(%arg0: i32) -> (i32, i32) {
    %c0_i32 = arith.constant 0 : i32
    %c0_i32_0 = arith.constant 0 : i32
    %c0_i32_1 = arith.constant 0 : i32
    return %c0_i32, %c0_i32_0 : i32, i32
  }
  func.func @transform_5(%arg0: i32) -> (i32, i32) {
    %c0_i32 = arith.constant 0 : i32
    %c0_i32_0 = arith.constant 0 : i32
    %c0_i32_1 = arith.constant 0 : i32
    return %c0_i32, %c0_i32_0 : i32, i32
  }
  func.func @transform_6(%arg0: i32) -> (i32, i32) {
    %c0_i32 = arith.constant 0 : i32
    %c0_i32_0 = arith.constant 0 : i32
    %c0_i32_1 = arith.constant 0 : i32
    return %c0_i32, %c0_i32_0 : i32, i32
  }
  func.func @transform_7(%arg0: i32) -> (i32, i32) {
    %c0_i32 = arith.constant 0 : i32
    %c0_i32_0 = arith.constant 0 : i32
    return %arg0, %c0_i32 : i32, i32
  }
}

module attributes {stable_mosaic.version = 11 : i64} {
  func.func @_mlp_kernel(%arg0: i32, %arg1: memref<128x32xf32, #tpu.memory_space<vmem>>, %arg2: memref<32x64xf32, #tpu.memory_space<vmem>>, %arg3: memref<1x64xf32, #tpu.memory_space<vmem>>, %arg4: memref<64x64xf32, #tpu.memory_space<vmem>>, %arg5: memref<1x64xf32, #tpu.memory_space<vmem>>, %arg6: memref<64x16xf32, #tpu.memory_space<vmem>>, %arg7: memref<1x16xf32, #tpu.memory_space<vmem>>, %arg8: memref<128x16xf32, #tpu.memory_space<vmem>>) attributes {dimension_semantics = [#tpu.dimension_semantics<parallel>], iteration_bounds = array<i64: 4>, scalar_prefetch = 0 : i64, scratch_operands = 0 : i64, tpu.core_type = #tpu.core_type<tc>, window_params = [{transform_indices = @transform_0, window_bounds = array<i64: 128, 32>}, {pipeline_mode = #tpu.pipeline_mode<synchronous>, transform_indices = @transform_1, window_bounds = array<i64: 32, 64>}, {pipeline_mode = #tpu.pipeline_mode<synchronous>, transform_indices = @transform_2, window_bounds = array<i64: 1, 64>}, {pipeline_mode = #tpu.pipeline_mode<synchronous>, transform_indices = @transform_3, window_bounds = array<i64: 64, 64>}, {pipeline_mode = #tpu.pipeline_mode<synchronous>, transform_indices = @transform_4, window_bounds = array<i64: 1, 64>}, {pipeline_mode = #tpu.pipeline_mode<synchronous>, transform_indices = @transform_5, window_bounds = array<i64: 64, 16>}, {pipeline_mode = #tpu.pipeline_mode<synchronous>, transform_indices = @transform_6, window_bounds = array<i64: 1, 16>}, {transform_indices = @transform_7, window_bounds = array<i64: 128, 16>}]} {
    %c0 = arith.constant 0 : index
    %c0_0 = arith.constant 0 : index
    %0 = vector.load %arg1[%c0, %c0_0] : memref<128x32xf32, #tpu.memory_space<vmem>>, vector<128x32xf32>
    %c0_1 = arith.constant 0 : index
    %c0_2 = arith.constant 0 : index
    %1 = vector.load %arg2[%c0_1, %c0_2] : memref<32x64xf32, #tpu.memory_space<vmem>>, vector<32x64xf32>
    %cst = arith.constant dense<0.000000e+00> : vector<128x64xf32>
    %2 = tpu.matmul %0, %1, %cst {dimension_numbers = #tpu.dot_dimension_numbers<[1], [0], [0], [1], [0, 0, 1, 1], [], []>} : vector<128x32xf32>, vector<32x64xf32>, vector<128x64xf32> -> vector<128x64xf32>
    %c0_3 = arith.constant 0 : index
    %c0_4 = arith.constant 0 : index
    %3 = vector.load %arg3[%c0_3, %c0_4] : memref<1x64xf32, #tpu.memory_space<vmem>>, vector<1x64xf32>
    %4 = vector.broadcast %3 : vector<1x64xf32> to vector<128x64xf32>
    %5 = arith.addf %2, %4 : vector<128x64xf32>
    %cst_5 = arith.constant 0.000000e+00 : f32
    %6 = vector.broadcast %cst_5 : f32 to vector<128x64xf32>
    %7 = arith.maximumf %5, %6 : vector<128x64xf32>
    %c0_6 = arith.constant 0 : index
    %c0_7 = arith.constant 0 : index
    %8 = vector.load %arg4[%c0_6, %c0_7] : memref<64x64xf32, #tpu.memory_space<vmem>>, vector<64x64xf32>
    %cst_8 = arith.constant dense<0.000000e+00> : vector<128x64xf32>
    %9 = tpu.matmul %7, %8, %cst_8 {dimension_numbers = #tpu.dot_dimension_numbers<[1], [0], [0], [1], [0, 0, 1, 1], [], []>} : vector<128x64xf32>, vector<64x64xf32>, vector<128x64xf32> -> vector<128x64xf32>
    %c0_9 = arith.constant 0 : index
    %c0_10 = arith.constant 0 : index
    %10 = vector.load %arg5[%c0_9, %c0_10] : memref<1x64xf32, #tpu.memory_space<vmem>>, vector<1x64xf32>
    %11 = vector.broadcast %10 : vector<1x64xf32> to vector<128x64xf32>
    %12 = arith.addf %9, %11 : vector<128x64xf32>
    %cst_11 = arith.constant 0.000000e+00 : f32
    %13 = vector.broadcast %cst_11 : f32 to vector<128x64xf32>
    %14 = arith.maximumf %12, %13 : vector<128x64xf32>
    %c0_12 = arith.constant 0 : index
    %c0_13 = arith.constant 0 : index
    %15 = vector.load %arg6[%c0_12, %c0_13] : memref<64x16xf32, #tpu.memory_space<vmem>>, vector<64x16xf32>
    %cst_14 = arith.constant dense<0.000000e+00> : vector<128x16xf32>
    %16 = tpu.matmul %14, %15, %cst_14 {dimension_numbers = #tpu.dot_dimension_numbers<[1], [0], [0], [1], [0, 0, 1, 1], [], []>} : vector<128x64xf32>, vector<64x16xf32>, vector<128x16xf32> -> vector<128x16xf32>
    %c0_15 = arith.constant 0 : index
    %c0_16 = arith.constant 0 : index
    %17 = vector.load %arg7[%c0_15, %c0_16] : memref<1x16xf32, #tpu.memory_space<vmem>>, vector<1x16xf32>
    %18 = vector.broadcast %17 : vector<1x16xf32> to vector<128x16xf32>
    %19 = arith.addf %16, %18 : vector<128x16xf32>
    %c0_17 = arith.constant 0 : index
    %c0_18 = arith.constant 0 : index
    %20 = vector.load %arg8[%c0_17, %c0_18] : memref<128x16xf32, #tpu.memory_space<vmem>>, vector<128x16xf32>
    tpu.vector_store %arg8[%c0_17, %c0_18], %19 {strides = array<i32>} : memref<128x16xf32, #tpu.memory_space<vmem>>, vector<128x16xf32>,
    return
  }
  func.func @transform_0(%arg0: i32) -> (i32, i32) {
    %c0_i32 = arith.constant 0 : i32
    %c0_i32_0 = arith.constant 0 : i32
    return %arg0, %c0_i32 : i32, i32
  }
  func.func @transform_1(%arg0: i32) -> (i32, i32) {
    %c0_i32 = arith.constant 0 : i32
    %c0_i32_0 = arith.constant 0 : i32
    %c0_i32_1 = arith.constant 0 : i32
    return %c0_i32, %c0_i32_0 : i32, i32
  }
  func.func @transform_2(%arg0: i32) -> (i32, i32) {
    %c0_i32 = arith.constant 0 : i32
    %c0_i32_0 = arith.constant 0 : i32
    %c0_i32_1 = arith.constant 0 : i32
    return %c0_i32, %c0_i32_0 : i32, i32
  }
  func.func @transform_3(%arg0: i32) -> (i32, i32) {
    %c0_i32 = arith.constant 0 : i32
    %c0_i32_0 = arith.constant 0 : i32
    %c0_i32_1 = arith.constant 0 : i32
    return %c0_i32, %c0_i32_0 : i32, i32
  }
  func.func @transform_4(%arg0: i32) -> (i32, i32) {
    %c0_i32 = arith.constant 0 : i32
    %c0_i32_0 = arith.constant 0 : i32
    %c0_i32_1 = arith.constant 0 : i32
    return %c0_i32, %c0_i32_0 : i32, i32
  }
  func.func @transform_5(%arg0: i32) -> (i32, i32) {
    %c0_i32 = arith.constant 0 : i32
    %c0_i32_0 = arith.constant 0 : i32
    %c0_i32_1 = arith.constant 0 : i32
    return %c0_i32, %c0_i32_0 : i32, i32
  }
  func.func @transform_6(%arg0: i32) -> (i32, i32) {
    %c0_i32 = arith.constant 0 : i32
    %c0_i32_0 = arith.constant 0 : i32
    %c0_i32_1 = arith.constant 0 : i32
    return %c0_i32, %c0_i32_0 : i32, i32
  }
  func.func @transform_7(%arg0: i32) -> (i32, i32) {
    %c0_i32 = arith.constant 0 : i32
    %c0_i32_0 = arith.constant 0 : i32
    return %arg0, %c0_i32 : i32, i32
  }
}

</mosaic_0001>

<bundles_post_ra>
// kernel: tpu_custom_call.1
= control target key start
LH: loop header
LB: loop body
LE: loop exit
PB: predicated region body
PF: predicated region fallthrough
CT: control target
= control target key end

     0   :  { %s1367_s24 = smov 0   ;;  %s1560_s0 = inlined_call_operand.vmem [shape: f32[512,32], index: 0, kind: input, shape index: {}]   ;;  %s1561_s1 = inlined_call_operand.vmem [shape: f32[32,64], index: 1, kind: input, shape index: {}]   ;;  %s1562_s2 = inlined_call_operand.vmem [shape: f32[1,64], index: 2, kind: input, shape index: {}]   ;;  %s1563_s3 = inlined_call_operand.vmem [shape: f32[64,64], index: 3, kind: input, shape index: {}]   ;;  %s1564_s4 = inlined_call_operand.vmem [shape: f32[1,64], index: 4, kind: input, shape index: {}]   ;;  %s1565_s5 = inlined_call_operand.vmem [shape: f32[64,16], index: 5, kind: input, shape index: {}]   ;;  %s1566_s6 = inlined_call_operand.vmem [shape: f32[1,16], index: 6, kind: input, shape index: {}]   ;;  %s1567_s7 = inlined_call_operand.vmem [shape: f32[512,16], index: 7, kind: output, shape index: {}]  }
   0x1 LB: > { %s1025_s25 = sadd.s32 4294967295, %s1325_s24   ;;  %p1029_p0 = scmp.ge.s32.totalorder %s1325_s24, 1  ;;  %s1325_s24 = sphi %s1367_s24, %s17_s24  }
   0x2   : > { %p238_p1 = scmp.lt.s32.totalorder %s1325_s24, 5 }
   0x4   : > { %p239_p2 = pnand %p1029_p0, %p238_p1 }
   0x5   : > { %v298_v0 = vld [vmem:[%s1561_s1] sm:$0xff] (!%p239_p2)  ;;  %v299_v1 = vld [vmem:[%s1561_s1 + $0x8] sm:$0xff] (!%p239_p2)  ;;  %v300_v2 = vld [vmem:[%s1561_s1 + $0x10] sm:$0xff] (!%p239_p2)  ;;  %s1030_s9 = sshll.u32 (!%p239_p2), %s1025_s25, 4  ;;  %vm309_vm0 = vcmask (!%p239_p2), 261120   ;;  %vm534_vm1 = vcmask (!%p239_p2), 523264  }
   0x6   : > { %242 = sbr.rel (%p239_p2) target bundleno = 698 (0x2ba), region = 48  ;;  %v1267_v3 = vpack.c.bf16 (!%p239_p2), %v299_v1, %v298_v0  ;;  %v301_v4 = vld [vmem:[%s1561_s1 + $0x18] sm:$0xff] (!%p239_p2)  ;;  %p271_p3 = scmp.lt.s32.totalorder (!%p239_p2), %s1030_s9, 63  ;;  %v519_v6 = vld [vmem:[%s1563_s3] sm:$0xff] (!%p239_p2)  ;;  %v520_v7 = vld [vmem:[%s1563_s3 + $0x8] sm:$0xff] (!%p239_p2)  ;;  %vm952_vm2 = vcmask (!%p239_p2), 130048  }
   0x7   : > { %v1271_v5 = vpack.c.bf16 (!%p239_p2), %v301_v4, %v300_v2  ;;  %v1275_v8 = vpack.c.bf16 (!%p239_p2), %v520_v7, %v519_v6  ;;  %v521_v10 = vld [vmem:[%s1563_s3 + $0x10] sm:$0xff] (!%p239_p2)  ;;  %v522_v11 = vld [vmem:[%s1563_s3 + $0x18] sm:$0xff] (!%p239_p2)  ;;  %v523_v18 = vld [vmem:[%s1563_s3 + $0x20] sm:$0xff] (!%p239_p2) }
   0x8   : > { %1268 = vmatprep.subr.bf16.mxu0 (!%p239_p2), %v1267_v3  ;;  %1307 = vmatprep.subr.bf16.mxu1 (!%p239_p2), %v1267_v3  ;;  %v1279_v17 = vpack.c.bf16 (!%p239_p2), %v522_v11, %v521_v10  ;;  %v524_v19 = vld [vmem:[%s1563_s3 + $0x28] sm:$0xff] (!%p239_p2)  ;;  %v525_v31 = vld [vmem:[%s1563_s3 + $0x30] sm:$0xff] (!%p239_p2)  ;;  %v526_v32 = vld [vmem:[%s1563_s3 + $0x38] sm:$0xff] (!%p239_p2) }
   0x9   : > { %1270 = vmatpush3.bf16.msra.mxu0 (!%p239_p2), %v1267_v3  ;;  %1309 = vmatpush3.bf16.msra.mxu1 (!%p239_p2), %v1267_v3  ;;  %v1283_v24 = vpack.c.bf16 (!%p239_p2), %v524_v19, %v523_v18  ;;  %v1287_v33 = vpack.c.bf16 (!%p239_p2), %v526_v32, %v525_v31  ;;  %v744_v34 = vld [vmem:[%s1565_s5] sm:$0xff] (!%p239_p2)  ;;  %v745_v35 = vld [vmem:[%s1565_s5 + $0x8] sm:$0xff] (!%p239_p2)  ;;  %v746_v36 = vld [vmem:[%s1565_s5 + $0x10] sm:$0xff] (!%p239_p2) }
   0xa   : > { %1272 = vmatprep.subr.bf16.mxu0 (!%p239_p2), %v1271_v5  ;;  %1308 = vmatprep.subr.bf16.mxu1 (!%p239_p2), %v1271_v5  ;;  %v1291_v37 = vpack.c.bf16 (!%p239_p2), %v745_v35, %v744_v34  ;;  %v747_v38 = vld [vmem:[%s1565_s5 + $0x18] sm:$0xff] (!%p239_p2)  ;;  %v748_v40 = vld [vmem:[%s1565_s5 + $0x20] sm:$0xff] (!%p239_p2)  ;;  %v749_v41 = vld [vmem:[%s1565_s5 + $0x28] sm:$0xff] (!%p239_p2) }
   0xb   : > { %v1295_v39 = vpack.c.bf16 (!%p239_p2), %v747_v38, %v746_v36  ;;  %v1299_v42 = vpack.c.bf16 (!%p239_p2), %v749_v41, %v748_v40  ;;  %v1034_v43 = vld [vmem:[%s1562_s2] ss:$0 sm:$0xff] (!%p239_p2) }
   0xc   : > { %v1051_v31 = vld [vmem:[%s1564_s4] ss:$0 sm:$0xff] (!%p239_p2) }
   0xd   : > { %s1569_s9 = smov (!%p271_p3, %s1030_s9), 63  ;;  %1274 = vmatpush3.bf16.msra.mxu0 %v1271_v5  ;;  %1310 = vmatpush3.bf16.msra.mxu1 %v1271_v5 }
   0xe   : > { %s1031_s16 = sshll.u32 %s1569_s9, 3  ;;  %1276 = vmatprep.subr.bf16.mxu1 %v1275_v8  ;;  %1292 = vmatprep.subr.bf16.mxu0 %v1291_v37 }
   0xf   : > { %s1401_s19 = scalar_lea.vmem %s1560_s0, %s1031_s16  ;;  %s1523_s15 = scalar_lea.vmem %s1567_s7, %s1031_s16 }
  0x10   : > { %v282_v9 = vld [vmem:[%s1401_s19] sm:$0xff]  ;;  %v283_v12 = vld [vmem:[%s1401_s19 + $0x8] sm:$0xff]  ;;  %v284_v13 = vld [vmem:[%s1401_s19 + $0x10] sm:$0xff] }
  0x11   : > { %1163 = vmatprep.mubr.msk.f32.mxu0 %vm309_vm0, %v282_v9  ;;  %v290_v14 = vld [vmem:[%s1401_s19 + $0x40] sm:$0xff]  ;;  %v291_v15 = vld [vmem:[%s1401_s19 + $0x48] sm:$0xff]  ;;  %v292_v16 = vld [vmem:[%s1401_s19 + $0x50] sm:$0xff] }
  0x12   : > { %1175 = vmatprep.mubr.msk.f32.mxu1 %vm309_vm0, %v290_v14  ;;  %1164 = vmatmul.mubr.msk.f32.vlgmr.msra.gmra.mrb[0].mxu0 %vm309_vm0, %v283_v12  ;;  %v285_v20 = vld [vmem:[%s1401_s19 + $0x18] sm:$0xff]  ;;  %v286_v21 = vld [vmem:[%s1401_s19 + $0x20] sm:$0xff]  ;;  %v287_v25 = vld [vmem:[%s1401_s19 + $0x28] sm:$0xff] }
  0x13   : > { %1166 = vmatprep.mubr.msk.f32.mxu0 %vm309_vm0, %v284_v13  ;;  %1176 = vmatmul.mubr.msk.f32.vlgmr.msra.gmra.mrb[0].mxu1 %vm309_vm0, %v291_v15  ;;  %v293_v22 = vld [vmem:[%s1401_s19 + $0x58] sm:$0xff]  ;;  %v294_v23 = vld [vmem:[%s1401_s19 + $0x60] sm:$0xff]  ;;  %v288_v26 = vld [vmem:[%s1401_s19 + $0x30] sm:$0xff] }
  0x14   : > { %1178 = vmatprep.mubr.msk.f32.mxu1 %vm309_vm0, %v292_v16  ;;  %1278 = vmatpush3.bf16.msra.mxu1 %v1275_v8  ;;  %v295_v27 = vld [vmem:[%s1401_s19 + $0x68] sm:$0xff]  ;;  %v296_v28 = vld [vmem:[%s1401_s19 + $0x70] sm:$0xff]  ;;  %v289_v29 = vld [vmem:[%s1401_s19 + $0x38] sm:$0xff] }
  0x15   : > { %1280 = vmatprep.subr.bf16.mxu1 %v1279_v17  ;;  %v297_v30 = vld [vmem:[%s1401_s19 + $0x78] sm:$0xff]  ;;  %1294 = vmatpush3.bf16.msra.mxu0 %v1291_v37 }
  0x16   : > { %1167 = vmatmul.mubr.msk.f32.gmra.mrb[2].mxu0 %vm309_vm0, %v285_v20  ;;  %1296 = vmatprep.subr.bf16.mxu0 %v1295_v39 }
  0x17   : > { %1169 = vmatprep.mubr.msk.f32.mxu0 %vm309_vm0, %v286_v21  ;;  %1179 = vmatmul.mubr.msk.f32.gmra.mrb[2].mxu1 %vm309_vm0, %v293_v22 }
  0x18   : > { %1181 = vmatprep.mubr.msk.f32.mxu1 %vm309_vm0, %v294_v23  ;;  %1282 = vmatpush3.bf16.msra.mxu1 %v1279_v17 }
  0x19   : > { %1284 = vmatprep.subr.bf16.mxu1 %v1283_v24  ;;  %1298 = vmatpush3.bf16.msra.mxu0 %v1295_v39 }
  0x1a   : > { %1170 = vmatmul.mubr.msk.f32.gmra.mrb[4].mxu0 %vm309_vm0, %v287_v25  ;;  %1300 = vmatprep.subr.bf16.mxu0 %v1299_v42 }
  0x1b   : > { %1172 = vmatprep.mubr.msk.f32.mxu0 %vm309_vm0, %v288_v26  ;;  %1182 = vmatmul.mubr.msk.f32.gmra.mrb[4].mxu1 %vm309_vm0, %v295_v27 }
  0x1c   : > { %1184 = vmatprep.mubr.msk.f32.mxu1 %vm309_vm0, %v296_v28  ;;  %1286 = vmatpush3.bf16.msra.mxu1 %v1283_v24  ;;  %v750_v28 = vld [vmem:[%s1565_s5 + $0x30] sm:$0xff] }
  0x1d   : > { %1288 = vmatprep.subr.bf16.mxu1 %v1287_v33  ;;  %1302 = vmatpush3.bf16.msra.mxu0 %v1299_v42 }
  0x1e   : > { %1173 = vmatmul.mubr.msk.f32.gmra.mrb[6].mxu0 %vm309_vm0, %v289_v29  ;;  %v751_v29 = vld [vmem:[%s1565_s5 + $0x38] sm:$0xff] }
  0x1f   : > { %1185 = vmatmul.mubr.msk.f32.gmra.mrb[6].mxu1 %vm309_vm0, %v297_v30  ;;  %v1303_v30 = vpack.c.bf16 %v751_v29, %v750_v28 }
  0x20   : > { %1290 = vmatpush3.bf16.msra.mxu1 %v1287_v33 }
  0x21   : > { %1304 = vmatprep.subr.bf16.mxu0 %v1303_v30 }
  0x22   : > { %1306 = vmatpush3.bf16.msra.mxu0 %v1303_v30 }
  0xe5   : > { %v1165_v44 = vpop.f32.mrb[0].mxu0 }
  0xe6   : > { %v430_v45 = vadd.f32 %v1165_v44, %v1034_v43  ;;  %v424_v46 = vpop.f32.mrb[1].mxu0  ;;  %v1177_v47 = vpop.f32.mrb[0].mxu1 }
  0xe7   : > { %v425_v48 = vadd.f32 %v1034_v43, %v424_v46  ;;  %v464_v49 = vpop.f32.mrb[1].mxu1  ;;  %v470_v15 = vadd.f32 %v1177_v47, %v1034_v43 }
  0xe8   : > { %v504_v52 = vmax.f32 %v430_v45, 0.0  ;;  %v465_v4 = vadd.f32 %v1034_v43, %v464_v49 }
  0xe9   : > { %v503_v50 = vmax.f32 %v425_v48, 0.0  ;;  %v1168_v51 = vpop.f32.mrb[2].mxu0  ;;  %v512_v18 = vmax.f32 %v470_v15, 0.0 }
  0xea   : > { %v440_v53 = vadd.f32 %v1168_v51, %v1034_v43  ;;  %v434_v54 = vpop.f32.mrb[3].mxu0  ;;  %v1180_v55 = vpop.f32.mrb[2].mxu1  ;;  %v511_v12 = vmax.f32 %v465_v4, 0.0 }
  0xeb   : > { %v435_v56 = vadd.f32 %v1034_v43, %v434_v54  ;;  %1203 = vmatprep.mubr.msk.f32.mxu1 %vm534_vm1, %v503_v50  ;;  %v474_v57 = vpop.f32.mrb[3].mxu1  ;;  %v480_v19 = vadd.f32 %v1180_v55, %v1034_v43 }
  0xec   : > { %1204 = vmatmul.mubr.msk.f32.vlgmr.msra.gmra.mrb[8].mxu1 %vm534_vm1, %v504_v52  ;;  %v506_v60 = vmax.f32 %v440_v53, 0.0  ;;  %v475_v13 = vadd.f32 %v1034_v43, %v474_v57 }
  0xed   : > { %v505_v58 = vmax.f32 %v435_v56, 0.0  ;;  %v1171_v59 = vpop.f32.mrb[4].mxu0  ;;  %v514_v22 = vmax.f32 %v480_v19, 0.0 }
  0xee   : > { %v450_v61 = vadd.f32 %v1171_v59, %v1034_v43  ;;  %v444_v62 = vpop.f32.mrb[5].mxu0  ;;  %v1183_v63 = vpop.f32.mrb[4].mxu1  ;;  %v513_v16 = vmax.f32 %v475_v13, 0.0 }
  0xef   : > { %v445_v0 = vadd.f32 %v1034_v43, %v444_v62  ;;  %1206 = vmatprep.mubr.msk.f32.mxu1 %vm534_vm1, %v505_v58  ;;  %v484_v1 = vpop.f32.mrb[5].mxu1  ;;  %v490_v23 = vadd.f32 %v1183_v63, %v1034_v43 }
  0xf0   : > { %1207 = vmatmul.mubr.msk.f32.gmra.mrb[10].mxu1 %vm534_vm1, %v506_v60  ;;  %v508_v5 = vmax.f32 %v450_v61, 0.0  ;;  %v485_v17 = vadd.f32 %v1034_v43, %v484_v1 }
  0xf1   : > { %v507_v2 = vmax.f32 %v445_v0, 0.0  ;;  %v1174_v3 = vpop.f32.mrb[6].mxu0  ;;  %v516_v25 = vmax.f32 %v490_v23, 0.0 }
  0xf2   : > { %v460_v6 = vadd.f32 %v1174_v3, %v1034_v43  ;;  %v454_v7 = vpop.f32.mrb[7].mxu0  ;;  %v1186_v8 = vpop.f32.mrb[6].mxu1  ;;  %v515_v20 = vmax.f32 %v485_v17, 0.0 }
  0xf3   : > { %v455_v9 = vadd.f32 %v1034_v43, %v454_v7  ;;  %1209 = vmatprep.mubr.msk.f32.mxu1 %vm534_vm1, %v507_v2  ;;  %v494_v10 = vpop.f32.mrb[7].mxu1  ;;  %v500_v26 = vadd.f32 %v1186_v8, %v1034_v43 }
  0xf4   : > { %1210 = vmatmul.mubr.msk.f32.gmra.mrb[12].mxu1 %vm534_vm1, %v508_v5  ;;  %v510_v14 = vmax.f32 %v460_v6, 0.0  ;;  %v495_v21 = vadd.f32 %v1034_v43, %v494_v10 }
  0xf5   : > { %v509_v11 = vmax.f32 %v455_v9, 0.0  ;;  %v518_v27 = vmax.f32 %v500_v26, 0.0 }
  0xf6   : > { %v517_v24 = vmax.f32 %v495_v21, 0.0 }
  0xf7   : > { %1212 = vmatprep.mubr.msk.f32.mxu1 %vm534_vm1, %v509_v11 }
  0xf8   : > { %1213 = vmatmul.mubr.msk.f32.gmra.mrb[14].mxu1 %vm534_vm1, %v510_v14 }
  0xf9   : > { %1215 = vmatprep.mubr.msk.f32.mxu1 %vm534_vm1, %v511_v12 }
  0xfc   : > { %1216 = vmatmul.mubr.msk.f32.gmra.mrb[16].mxu1 %vm534_vm1, %v512_v18 }
  0xfd   : > { %1218 = vmatprep.mubr.msk.f32.mxu1 %vm534_vm1, %v513_v16  ;;  %v1068_v16 = vld [vmem:[%s1566_s6] ss:$0 sm:$0xff] }
 0x100   : > { %1219 = vmatmul.mubr.msk.f32.gmra.mrb[18].mxu1 %vm534_vm1, %v514_v22 }
 0x101   : > { %1221 = vmatprep.mubr.msk.f32.mxu1 %vm534_vm1, %v515_v20 }
 0x104   : > { %1222 = vmatmul.mubr.msk.f32.gmra.mrb[20].mxu1 %vm534_vm1, %v516_v25 }
 0x105   : > { %1224 = vmatprep.mubr.msk.f32.mxu1 %vm534_vm1, %v517_v24 }
 0x108   : > { %1225 = vmatmul.mubr.msk.f32.gmra.mrb[22].mxu1 %vm534_vm1, %v518_v27 }
 0x1bf   : > { %v1205_v32 = vpop.f32.mrb[8].mxu1 }
 0x1c0   : > { %v655_v33 = vadd.f32 %v1205_v32, %v1051_v31  ;;  %v649_v34 = vpop.f32.mrb[9].mxu1 }
 0x1c1   : > { %v650_v35 = vadd.f32 %v1051_v31, %v649_v34 }
 0x1c2   : > { %v729_v38 = vmax.f32 %v655_v33, 0.0 }
 0x1c3   : > { %v728_v36 = vmax.f32 %v650_v35, 0.0  ;;  %v1208_v37 = vpop.f32.mrb[10].mxu1 }
 0x1c4   : > { %v665_v39 = vadd.f32 %v1208_v37, %v1051_v31  ;;  %v659_v40 = vpop.f32.mrb[11].mxu1 }
 0x1c5   : > { %v660_v41 = vadd.f32 %v1051_v31, %v659_v40  ;;  %1243 = vmatprep.mubr.msk.f32.mxu0 %vm534_vm1, %v728_v36 }
 0x1c6   : > { %1244 = vmatmul.mubr.msk.f32.vlgmr.msra.gmra.mrb[8].mxu0 %vm534_vm1, %v729_v38  ;;  %v731_v44 = vmax.f32 %v665_v39, 0.0 }
 0x1c7   : > { %v730_v42 = vmax.f32 %v660_v41, 0.0  ;;  %v1211_v43 = vpop.f32.mrb[12].mxu1 }
 0x1c8   : > { %v675_v45 = vadd.f32 %v1211_v43, %v1051_v31  ;;  %v669_v46 = vpop.f32.mrb[13].mxu1 }
 0x1c9   : > { %v670_v47 = vadd.f32 %v1051_v31, %v669_v46  ;;  %1246 = vmatprep.mubr.msk.f32.mxu0 %vm534_vm1, %v730_v42 }
 0x1ca   : > { %1247 = vmatmul.mubr.msk.f32.gmra.mrb[10].mxu0 %vm534_vm1, %v731_v44  ;;  %v733_v50 = vmax.f32 %v675_v45, 0.0 }
 0x1cb   : > { %v732_v48 = vmax.f32 %v670_v47, 0.0  ;;  %v1214_v49 = vpop.f32.mrb[14].mxu1 }
 0x1cc   : > { %v685_v51 = vadd.f32 %v1214_v49, %v1051_v31  ;;  %v679_v52 = vpop.f32.mrb[15].mxu1 }
 0x1cd   : > { %v680_v53 = vadd.f32 %v1051_v31, %v679_v52  ;;  %1249 = vmatprep.mubr.msk.f32.mxu0 %vm534_vm1, %v732_v48 }
 0x1ce   : > { %1250 = vmatmul.mubr.msk.f32.gmra.mrb[12].mxu0 %vm534_vm1, %v733_v50  ;;  %v735_v56 = vmax.f32 %v685_v51, 0.0 }
 0x1cf   : > { %v734_v54 = vmax.f32 %v680_v53, 0.0  ;;  %v1217_v55 = vpop.f32.mrb[16].mxu1 }
 0x1d0   : > { %v695_v57 = vadd.f32 %v1217_v55, %v1051_v31  ;;  %v689_v58 = vpop.f32.mrb[17].mxu1 }
 0x1d1   : > { %v690_v59 = vadd.f32 %v1051_v31, %v689_v58  ;;  %1252 = vmatprep.mubr.msk.f32.mxu0 %vm534_vm1, %v734_v54 }
 0x1d2   : > { %1253 = vmatmul.mubr.msk.f32.gmra.mrb[14].mxu0 %vm534_vm1, %v735_v56  ;;  %v737_v62 = vmax.f32 %v695_v57, 0.0 }
 0x1d3   : > { %v736_v60 = vmax.f32 %v690_v59, 0.0  ;;  %v1220_v61 = vpop.f32.mrb[18].mxu1 }
 0x1d4   : > { %v705_v63 = vadd.f32 %v1220_v61, %v1051_v31  ;;  %v699_v0 = vpop.f32.mrb[19].mxu1 }
 0x1d5   : > { %v700_v1 = vadd.f32 %v1051_v31, %v699_v0  ;;  %1255 = vmatprep.mubr.msk.f32.mxu0 %vm534_vm1, %v736_v60 }
 0x1d6   : > { %1256 = vmatmul.mubr.msk.f32.gmra.mrb[16].mxu0 %vm534_vm1, %v737_v62  ;;  %v739_v4 = vmax.f32 %v705_v63, 0.0 }
 0x1d7   : > { %v738_v2 = vmax.f32 %v700_v1, 0.0  ;;  %v1223_v3 = vpop.f32.mrb[20].mxu1 }
 0x1d8   : > { %v715_v5 = vadd.f32 %v1223_v3, %v1051_v31  ;;  %v709_v6 = vpop.f32.mrb[21].mxu1 }
 0x1d9   : > { %v710_v7 = vadd.f32 %v1051_v31, %v709_v6  ;;  %1258 = vmatprep.mubr.msk.f32.mxu0 %vm534_vm1, %v738_v2 }
 0x1da   : > { %1259 = vmatmul.mubr.msk.f32.gmra.mrb[18].mxu0 %vm534_vm1, %v739_v4  ;;  %v741_v10 = vmax.f32 %v715_v5, 0.0 }
 0x1db   : > { %v740_v8 = vmax.f32 %v710_v7, 0.0  ;;  %v1226_v9 = vpop.f32.mrb[22].mxu1 }
 0x1dc   : > { %v725_v11 = vadd.f32 %v1226_v9, %v1051_v31  ;;  %v719_v12 = vpop.f32.mrb[23].mxu1 }
 0x1dd   : > { %v720_v13 = vadd.f32 %v1051_v31, %v719_v12  ;;  %1261 = vmatprep.mubr.msk.f32.mxu0 %vm534_vm1, %v740_v8 }
 0x1de   : > { %1262 = vmatmul.mubr.msk.f32.gmra.mrb[20].mxu0 %vm534_vm1, %v741_v10  ;;  %v743_v15 = vmax.f32 %v725_v11, 0.0 }
 0x1df   : > { %v742_v14 = vmax.f32 %v720_v13, 0.0 }
 0x1e1   : > { %1264 = vmatprep.mubr.msk.f32.mxu0 %vm534_vm1, %v742_v14 }
 0x1e2   : > { %1265 = vmatmul.mubr.msk.f32.gmra.mrb[22].mxu0 %vm534_vm1, %v743_v15 }
 0x299   : > { %v1245_v17 = vpop.f32.mrb[8].mxu0 }
 0x29a   : > { %v879_v18 = vadd.f32 %v1245_v17, %v1068_v16  ;;  %v873_v19 = vpop.f32.mrb[9].mxu0 }
 0x29b   : > { %v874_v20 = vadd.f32 %v1068_v16, %v873_v19 }
 0x29c   : > { %954 = vst.msk [vmem:[%s1523_s15 + $0x8] sm:$0xff] %vm952_vm2, %v879_v18 }
 0x29d   : > { %953 = vst.msk [vmem:[%s1523_s15] sm:$0xff] %vm952_vm2, %v874_v20  ;;  %v1248_v21 = vpop.f32.mrb[10].mxu0 }
 0x29e   : > { %v889_v22 = vadd.f32 %v1248_v21, %v1068_v16  ;;  %v883_v23 = vpop.f32.mrb[11].mxu0 }
 0x29f   : > { %v884_v24 = vadd.f32 %v1068_v16, %v883_v23 }
 0x2a0   : > { %956 = vst.msk [vmem:[%s1523_s15 + $0x18] sm:$0xff] %vm952_vm2, %v889_v22 }
 0x2a1   : > { %955 = vst.msk [vmem:[%s1523_s15 + $0x10] sm:$0xff] %vm952_vm2, %v884_v24  ;;  %v1251_v25 = vpop.f32.mrb[12].mxu0 }
 0x2a2   : > { %v899_v26 = vadd.f32 %v1251_v25, %v1068_v16  ;;  %v893_v27 = vpop.f32.mrb[13].mxu0 }
 0x2a3   : > { %v894_v28 = vadd.f32 %v1068_v16, %v893_v27 }
 0x2a4   : > { %958 = vst.msk [vmem:[%s1523_s15 + $0x28] sm:$0xff] %vm952_vm2, %v899_v26 }
 0x2a5   : > { %957 = vst.msk [vmem:[%s1523_s15 + $0x20] sm:$0xff] %vm952_vm2, %v894_v28  ;;  %v1254_v29 = vpop.f32.mrb[14].mxu0 }
 0x2a6   : > { %v909_v30 = vadd.f32 %v1254_v29, %v1068_v16  ;;  %v903_v31 = vpop.f32.mrb[15].mxu0 }
 0x2a7   : > { %v904_v32 = vadd.f32 %v1068_v16, %v903_v31 }
 0x2a8   : > { %960 = vst.msk [vmem:[%s1523_s15 + $0x38] sm:$0xff] %vm952_vm2, %v909_v30 }
 0x2a9   : > { %959 = vst.msk [vmem:[%s1523_s15 + $0x30] sm:$0xff] %vm952_vm2, %v904_v32  ;;  %v1257_v33 = vpop.f32.mrb[16].mxu0 }
 0x2aa   : > { %v919_v34 = vadd.f32 %v1257_v33, %v1068_v16  ;;  %v913_v35 = vpop.f32.mrb[17].mxu0 }
 0x2ab   : > { %v914_v36 = vadd.f32 %v1068_v16, %v913_v35 }
 0x2ac   : > { %962 = vst.msk [vmem:[%s1523_s15 + $0x48] sm:$0xff] %vm952_vm2, %v919_v34 }
 0x2ad   : > { %961 = vst.msk [vmem:[%s1523_s15 + $0x40] sm:$0xff] %vm952_vm2, %v914_v36  ;;  %v1260_v37 = vpop.f32.mrb[18].mxu0 }
 0x2ae   : > { %v929_v38 = vadd.f32 %v1260_v37, %v1068_v16  ;;  %v923_v39 = vpop.f32.mrb[19].mxu0 }
 0x2af   : > { %v924_v40 = vadd.f32 %v1068_v16, %v923_v39 }
 0x2b0   : > { %964 = vst.msk [vmem:[%s1523_s15 + $0x58] sm:$0xff] %vm952_vm2, %v929_v38 }
 0x2b1   : > { %963 = vst.msk [vmem:[%s1523_s15 + $0x50] sm:$0xff] %vm952_vm2, %v924_v40  ;;  %v1263_v41 = vpop.f32.mrb[20].mxu0 }
 0x2b2   : > { %v939_v42 = vadd.f32 %v1263_v41, %v1068_v16  ;;  %v933_v43 = vpop.f32.mrb[21].mxu0 }
 0x2b3   : > { %v934_v44 = vadd.f32 %v1068_v16, %v933_v43 }
 0x2b4   : > { %966 = vst.msk [vmem:[%s1523_s15 + $0x68] sm:$0xff] %vm952_vm2, %v939_v42 }
 0x2b5   : > { %965 = vst.msk [vmem:[%s1523_s15 + $0x60] sm:$0xff] %vm952_vm2, %v934_v44  ;;  %v1266_v45 = vpop.f32.mrb[22].mxu0 }
 0x2b6   : > { %v949_v46 = vadd.f32 %v1266_v45, %v1068_v16  ;;  %v943_v47 = vpop.f32.mrb[23].mxu0 }
 0x2b7   : > { %v944_v48 = vadd.f32 %v1068_v16, %v943_v47 }
 0x2b8   : > { %968 = vst.msk [vmem:[%s1523_s15 + $0x78] sm:$0xff] %vm952_vm2, %v949_v46 }
 0x2b9   : > { %967 = vst.msk [vmem:[%s1523_s15 + $0x70] sm:$0xff] %vm952_vm2, %v944_v48 }
 0x2ba PF: > { %s17_s24 = sadd.s32 1, %s1325_s24  }
 0x2bb   : > { %p14_p4 = scmp.ge.s32.totalorder %s17_s24, 6  }
 0x2bd   :  { %16 = sbr.rel (!%p14_p4) target bundleno = 1 (0x1), region = 78 }

// kernel: tpu_custom_call.1
= control target key start
LH: loop header
LB: loop body
LE: loop exit
PB: predicated region body
PF: predicated region fallthrough
CT: control target
= control target key end

     0   :  { %s1367_s24 = smov 0   ;;  %s1560_s0 = inlined_call_operand.vmem [shape: f32[512,32], index: 0, kind: input, shape index: {}]   ;;  %s1561_s1 = inlined_call_operand.vmem [shape: f32[32,64], index: 1, kind: input, shape index: {}]   ;;  %s1562_s2 = inlined_call_operand.vmem [shape: f32[1,64], index: 2, kind: input, shape index: {}]   ;;  %s1563_s3 = inlined_call_operand.vmem [shape: f32[64,64], index: 3, kind: input, shape index: {}]   ;;  %s1564_s4 = inlined_call_operand.vmem [shape: f32[1,64], index: 4, kind: input, shape index: {}]   ;;  %s1565_s5 = inlined_call_operand.vmem [shape: f32[64,16], index: 5, kind: input, shape index: {}]   ;;  %s1566_s6 = inlined_call_operand.vmem [shape: f32[1,16], index: 6, kind: input, shape index: {}]   ;;  %s1567_s7 = inlined_call_operand.vmem [shape: f32[512,16], index: 7, kind: output, shape index: {}]  }
   0x1 LB: > { %s1025_s25 = sadd.s32 4294967295, %s1325_s24   ;;  %p1029_p0 = scmp.ge.s32.totalorder %s1325_s24, 1  ;;  %s1325_s24 = sphi %s1367_s24, %s17_s24  }
   0x2   : > { %p238_p1 = scmp.lt.s32.totalorder %s1325_s24, 5 }
   0x4   : > { %p239_p2 = pnand %p1029_p0, %p238_p1 }
   0x5   : > { %v298_v0 = vld [vmem:[%s1561_s1] sm:$0xff] (!%p239_p2)  ;;  %v299_v1 = vld [vmem:[%s1561_s1 + $0x8] sm:$0xff] (!%p239_p2)  ;;  %v300_v2 = vld [vmem:[%s1561_s1 + $0x10] sm:$0xff] (!%p239_p2)  ;;  %s1030_s9 = sshll.u32 (!%p239_p2), %s1025_s25, 4  ;;  %vm309_vm0 = vcmask (!%p239_p2), 261120   ;;  %vm534_vm1 = vcmask (!%p239_p2), 523264  }
   0x6   : > { %242 = sbr.rel (%p239_p2) target bundleno = 698 (0x2ba), region = 48  ;;  %v1267_v3 = vpack.c.bf16 (!%p239_p2), %v299_v1, %v298_v0  ;;  %v301_v4 = vld [vmem:[%s1561_s1 + $0x18] sm:$0xff] (!%p239_p2)  ;;  %p271_p3 = scmp.lt.s32.totalorder (!%p239_p2), %s1030_s9, 63  ;;  %v519_v6 = vld [vmem:[%s1563_s3] sm:$0xff] (!%p239_p2)  ;;  %v520_v7 = vld [vmem:[%s1563_s3 + $0x8] sm:$0xff] (!%p239_p2)  ;;  %vm952_vm2 = vcmask (!%p239_p2), 130048  }
   0x7   : > { %v1271_v5 = vpack.c.bf16 (!%p239_p2), %v301_v4, %v300_v2  ;;  %v1275_v8 = vpack.c.bf16 (!%p239_p2), %v520_v7, %v519_v6  ;;  %v521_v10 = vld [vmem:[%s1563_s3 + $0x10] sm:$0xff] (!%p239_p2)  ;;  %v522_v11 = vld [vmem:[%s1563_s3 + $0x18] sm:$0xff] (!%p239_p2)  ;;  %v523_v18 = vld [vmem:[%s1563_s3 + $0x20] sm:$0xff] (!%p239_p2) }
   0x8   : > { %1268 = vmatprep.subr.bf16.mxu0 (!%p239_p2), %v1267_v3  ;;  %1307 = vmatprep.subr.bf16.mxu1 (!%p239_p2), %v1267_v3  ;;  %v1279_v17 = vpack.c.bf16 (!%p239_p2), %v522_v11, %v521_v10  ;;  %v524_v19 = vld [vmem:[%s1563_s3 + $0x28] sm:$0xff] (!%p239_p2)  ;;  %v525_v31 = vld [vmem:[%s1563_s3 + $0x30] sm:$0xff] (!%p239_p2)  ;;  %v526_v32 = vld [vmem:[%s1563_s3 + $0x38] sm:$0xff] (!%p239_p2) }
   0x9   : > { %1270 = vmatpush3.bf16.msra.mxu0 (!%p239_p2), %v1267_v3  ;;  %1309 = vmatpush3.bf16.msra.mxu1 (!%p239_p2), %v1267_v3  ;;  %v1283_v24 = vpack.c.bf16 (!%p239_p2), %v524_v19, %v523_v18  ;;  %v1287_v33 = vpack.c.bf16 (!%p239_p2), %v526_v32, %v525_v31  ;;  %v744_v34 = vld [vmem:[%s1565_s5] sm:$0xff] (!%p239_p2)  ;;  %v745_v35 = vld [vmem:[%s1565_s5 + $0x8] sm:$0xff] (!%p239_p2)  ;;  %v746_v36 = vld [vmem:[%s1565_s5 + $0x10] sm:$0xff] (!%p239_p2) }
   0xa   : > { %1272 = vmatprep.subr.bf16.mxu0 (!%p239_p2), %v1271_v5  ;;  %1308 = vmatprep.subr.bf16.mxu1 (!%p239_p2), %v1271_v5  ;;  %v1291_v37 = vpack.c.bf16 (!%p239_p2), %v745_v35, %v744_v34  ;;  %v747_v38 = vld [vmem:[%s1565_s5 + $0x18] sm:$0xff] (!%p239_p2)  ;;  %v748_v40 = vld [vmem:[%s1565_s5 + $0x20] sm:$0xff] (!%p239_p2)  ;;  %v749_v41 = vld [vmem:[%s1565_s5 + $0x28] sm:$0xff] (!%p239_p2) }
   0xb   : > { %v1295_v39 = vpack.c.bf16 (!%p239_p2), %v747_v38, %v746_v36  ;;  %v1299_v42 = vpack.c.bf16 (!%p239_p2), %v749_v41, %v748_v40  ;;  %v1034_v43 = vld [vmem:[%s1562_s2] ss:$0 sm:$0xff] (!%p239_p2) }
   0xc   : > { %v1051_v31 = vld [vmem:[%s1564_s4] ss:$0 sm:$0xff] (!%p239_p2) }
   0xd   : > { %s1569_s9 = smov (!%p271_p3, %s1030_s9), 63  ;;  %1274 = vmatpush3.bf16.msra.mxu0 %v1271_v5  ;;  %1310 = vmatpush3.bf16.msra.mxu1 %v1271_v5 }
   0xe   : > { %s1031_s16 = sshll.u32 %s1569_s9, 3  ;;  %1276 = vmatprep.subr.bf16.mxu1 %v1275_v8  ;;  %1292 = vmatprep.subr.bf16.mxu0 %v1291_v37 }
   0xf   : > { %s1401_s19 = scalar_lea.vmem %s1560_s0, %s1031_s16  ;;  %s1523_s15 = scalar_lea.vmem %s1567_s7, %s1031_s16 }
  0x10   : > { %v282_v9 = vld [vmem:[%s1401_s19] sm:$0xff]  ;;  %v283_v12 = vld [vmem:[%s1401_s19 + $0x8] sm:$0xff]  ;;  %v284_v13 = vld [vmem:[%s1401_s19 + $0x10] sm:$0xff] }
  0x11   : > { %1163 = vmatprep.mubr.msk.f32.mxu0 %vm309_vm0, %v282_v9  ;;  %v290_v14 = vld [vmem:[%s1401_s19 + $0x40] sm:$0xff]  ;;  %v291_v15 = vld [vmem:[%s1401_s19 + $0x48] sm:$0xff]  ;;  %v292_v16 = vld [vmem:[%s1401_s19 + $0x50] sm:$0xff] }
  0x12   : > { %1175 = vmatprep.mubr.msk.f32.mxu1 %vm309_vm0, %v290_v14  ;;  %1164 = vmatmul.mubr.msk.f32.vlgmr.msra.gmra.mrb[0].mxu0 %vm309_vm0, %v283_v12  ;;  %v285_v20 = vld [vmem:[%s1401_s19 + $0x18] sm:$0xff]  ;;  %v286_v21 = vld [vmem:[%s1401_s19 + $0x20] sm:$0xff]  ;;  %v287_v25 = vld [vmem:[%s1401_s19 + $0x28] sm:$0xff] }
  0x13   : > { %1166 = vmatprep.mubr.msk.f32.mxu0 %vm309_vm0, %v284_v13  ;;  %1176 = vmatmul.mubr.msk.f32.vlgmr.msra.gmra.mrb[0].mxu1 %vm309_vm0, %v291_v15  ;;  %v293_v22 = vld [vmem:[%s1401_s19 + $0x58] sm:$0xff]  ;;  %v294_v23 = vld [vmem:[%s1401_s19 + $0x60] sm:$0xff]  ;;  %v288_v26 = vld [vmem:[%s1401_s19 + $0x30] sm:$0xff] }
  0x14   : > { %1178 = vmatprep.mubr.msk.f32.mxu1 %vm309_vm0, %v292_v16  ;;  %1278 = vmatpush3.bf16.msra.mxu1 %v1275_v8  ;;  %v295_v27 = vld [vmem:[%s1401_s19 + $0x68] sm:$0xff]  ;;  %v296_v28 = vld [vmem:[%s1401_s19 + $0x70] sm:$0xff]  ;;  %v289_v29 = vld [vmem:[%s1401_s19 + $0x38] sm:$0xff] }
  0x15   : > { %1280 = vmatprep.subr.bf16.mxu1 %v1279_v17  ;;  %v297_v30 = vld [vmem:[%s1401_s19 + $0x78] sm:$0xff]  ;;  %1294 = vmatpush3.bf16.msra.mxu0 %v1291_v37 }
  0x16   : > { %1167 = vmatmul.mubr.msk.f32.gmra.mrb[2].mxu0 %vm309_vm0, %v285_v20  ;;  %1296 = vmatprep.subr.bf16.mxu0 %v1295_v39 }
  0x17   : > { %1169 = vmatprep.mubr.msk.f32.mxu0 %vm309_vm0, %v286_v21  ;;  %1179 = vmatmul.mubr.msk.f32.gmra.mrb[2].mxu1 %vm309_vm0, %v293_v22 }
  0x18   : > { %1181 = vmatprep.mubr.msk.f32.mxu1 %vm309_vm0, %v294_v23  ;;  %1282 = vmatpush3.bf16.msra.mxu1 %v1279_v17 }
  0x19   : > { %1284 = vmatprep.subr.bf16.mxu1 %v1283_v24  ;;  %1298 = vmatpush3.bf16.msra.mxu0 %v1295_v39 }
  0x1a   : > { %1170 = vmatmul.mubr.msk.f32.gmra.mrb[4].mxu0 %vm309_vm0, %v287_v25  ;;  %1300 = vmatprep.subr.bf16.mxu0 %v1299_v42 }
  0x1b   : > { %1172 = vmatprep.mubr.msk.f32.mxu0 %vm309_vm0, %v288_v26  ;;  %1182 = vmatmul.mubr.msk.f32.gmra.mrb[4].mxu1 %vm309_vm0, %v295_v27 }
  0x1c   : > { %1184 = vmatprep.mubr.msk.f32.mxu1 %vm309_vm0, %v296_v28  ;;  %1286 = vmatpush3.bf16.msra.mxu1 %v1283_v24  ;;  %v750_v28 = vld [vmem:[%s1565_s5 + $0x30] sm:$0xff] }
  0x1d   : > { %1288 = vmatprep.subr.bf16.mxu1 %v1287_v33  ;;  %1302 = vmatpush3.bf16.msra.mxu0 %v1299_v42 }
  0x1e   : > { %1173 = vmatmul.mubr.msk.f32.gmra.mrb[6].mxu0 %vm309_vm0, %v289_v29  ;;  %v751_v29 = vld [vmem:[%s1565_s5 + $0x38] sm:$0xff] }
  0x1f   : > { %1185 = vmatmul.mubr.msk.f32.gmra.mrb[6].mxu1 %vm309_vm0, %v297_v30  ;;  %v1303_v30 = vpack.c.bf16 %v751_v29, %v750_v28 }
  0x20   : > { %1290 = vmatpush3.bf16.msra.mxu1 %v1287_v33 }
  0x21   : > { %1304 = vmatprep.subr.bf16.mxu0 %v1303_v30 }
  0x22   : > { %1306 = vmatpush3.bf16.msra.mxu0 %v1303_v30 }
  0xe5   : > { %v1165_v44 = vpop.f32.mrb[0].mxu0 }
  0xe6   : > { %v430_v45 = vadd.f32 %v1165_v44, %v1034_v43  ;;  %v424_v46 = vpop.f32.mrb[1].mxu0  ;;  %v1177_v47 = vpop.f32.mrb[0].mxu1 }
  0xe7   : > { %v425_v48 = vadd.f32 %v1034_v43, %v424_v46  ;;  %v464_v49 = vpop.f32.mrb[1].mxu1  ;;  %v470_v15 = vadd.f32 %v1177_v47, %v1034_v43 }
  0xe8   : > { %v504_v52 = vmax.f32 %v430_v45, 0.0  ;;  %v465_v4 = vadd.f32 %v1034_v43, %v464_v49 }
  0xe9   : > { %v503_v50 = vmax.f32 %v425_v48, 0.0  ;;  %v1168_v51 = vpop.f32.mrb[2].mxu0  ;;  %v512_v18 = vmax.f32 %v470_v15, 0.0 }
  0xea   : > { %v440_v53 = vadd.f32 %v1168_v51, %v1034_v43  ;;  %v434_v54 = vpop.f32.mrb[3].mxu0  ;;  %v1180_v55 = vpop.f32.mrb[2].mxu1  ;;  %v511_v12 = vmax.f32 %v465_v4, 0.0 }
  0xeb   : > { %v435_v56 = vadd.f32 %v1034_v43, %v434_v54  ;;  %1203 = vmatprep.mubr.msk.f32.mxu1 %vm534_vm1, %v503_v50  ;;  %v474_v57 = vpop.f32.mrb[3].mxu1  ;;  %v480_v19 = vadd.f32 %v1180_v55, %v1034_v43 }
  0xec   : > { %1204 = vmatmul.mubr.msk.f32.vlgmr.msra.gmra.mrb[8].mxu1 %vm534_vm1, %v504_v52  ;;  %v506_v60 = vmax.f32 %v440_v53, 0.0  ;;  %v475_v13 = vadd.f32 %v1034_v43, %v474_v57 }
  0xed   : > { %v505_v58 = vmax.f32 %v435_v56, 0.0  ;;  %v1171_v59 = vpop.f32.mrb[4].mxu0  ;;  %v514_v22 = vmax.f32 %v480_v19, 0.0 }
  0xee   : > { %v450_v61 = vadd.f32 %v1171_v59, %v1034_v43  ;;  %v444_v62 = vpop.f32.mrb[5].mxu0  ;;  %v1183_v63 = vpop.f32.mrb[4].mxu1  ;;  %v513_v16 = vmax.f32 %v475_v13, 0.0 }
  0xef   : > { %v445_v0 = vadd.f32 %v1034_v43, %v444_v62  ;;  %1206 = vmatprep.mubr.msk.f32.mxu1 %vm534_vm1, %v505_v58  ;;  %v484_v1 = vpop.f32.mrb[5].mxu1  ;;  %v490_v23 = vadd.f32 %v1183_v63, %v1034_v43 }
  0xf0   : > { %1207 = vmatmul.mubr.msk.f32.gmra.mrb[10].mxu1 %vm534_vm1, %v506_v60  ;;  %v508_v5 = vmax.f32 %v450_v61, 0.0  ;;  %v485_v17 = vadd.f32 %v1034_v43, %v484_v1 }
  0xf1   : > { %v507_v2 = vmax.f32 %v445_v0, 0.0  ;;  %v1174_v3 = vpop.f32.mrb[6].mxu0  ;;  %v516_v25 = vmax.f32 %v490_v23, 0.0 }
  0xf2   : > { %v460_v6 = vadd.f32 %v1174_v3, %v1034_v43  ;;  %v454_v7 = vpop.f32.mrb[7].mxu0  ;;  %v1186_v8 = vpop.f32.mrb[6].mxu1  ;;  %v515_v20 = vmax.f32 %v485_v17, 0.0 }
  0xf3   : > { %v455_v9 = vadd.f32 %v1034_v43, %v454_v7  ;;  %1209 = vmatprep.mubr.msk.f32.mxu1 %vm534_vm1, %v507_v2  ;;  %v494_v10 = vpop.f32.mrb[7].mxu1  ;;  %v500_v26 = vadd.f32 %v1186_v8, %v1034_v43 }
  0xf4   : > { %1210 = vmatmul.mubr.msk.f32.gmra.mrb[12].mxu1 %vm534_vm1, %v508_v5  ;;  %v510_v14 = vmax.f32 %v460_v6, 0.0  ;;  %v495_v21 = vadd.f32 %v1034_v43, %v494_v10 }
  0xf5   : > { %v509_v11 = vmax.f32 %v455_v9, 0.0  ;;  %v518_v27 = vmax.f32 %v500_v26, 0.0 }
  0xf6   : > { %v517_v24 = vmax.f32 %v495_v21, 0.0 }
  0xf7   : > { %1212 = vmatprep.mubr.msk.f32.mxu1 %vm534_vm1, %v509_v11 }
  0xf8   : > { %1213 = vmatmul.mubr.msk.f32.gmra.mrb[14].mxu1 %vm534_vm1, %v510_v14 }
  0xf9   : > { %1215 = vmatprep.mubr.msk.f32.mxu1 %vm534_vm1, %v511_v12 }
  0xfc   : > { %1216 = vmatmul.mubr.msk.f32.gmra.mrb[16].mxu1 %vm534_vm1, %v512_v18 }
  0xfd   : > { %1218 = vmatprep.mubr.msk.f32.mxu1 %vm534_vm1, %v513_v16  ;;  %v1068_v16 = vld [vmem:[%s1566_s6] ss:$0 sm:$0xff] }
 0x100   : > { %1219 = vmatmul.mubr.msk.f32.gmra.mrb[18].mxu1 %vm534_vm1, %v514_v22 }
 0x101   : > { %1221 = vmatprep.mubr.msk.f32.mxu1 %vm534_vm1, %v515_v20 }
 0x104   : > { %1222 = vmatmul.mubr.msk.f32.gmra.mrb[20].mxu1 %vm534_vm1, %v516_v25 }
 0x105   : > { %1224 = vmatprep.mubr.msk.f32.mxu1 %vm534_vm1, %v517_v24 }
 0x108   : > { %1225 = vmatmul.mubr.msk.f32.gmra.mrb[22].mxu1 %vm534_vm1, %v518_v27 }
 0x1bf   : > { %v1205_v32 = vpop.f32.mrb[8].mxu1 }
 0x1c0   : > { %v655_v33 = vadd.f32 %v1205_v32, %v1051_v31  ;;  %v649_v34 = vpop.f32.mrb[9].mxu1 }
 0x1c1   : > { %v650_v35 = vadd.f32 %v1051_v31, %v649_v34 }
 0x1c2   : > { %v729_v38 = vmax.f32 %v655_v33, 0.0 }
 0x1c3   : > { %v728_v36 = vmax.f32 %v650_v35, 0.0  ;;  %v1208_v37 = vpop.f32.mrb[10].mxu1 }
 0x1c4   : > { %v665_v39 = vadd.f32 %v1208_v37, %v1051_v31  ;;  %v659_v40 = vpop.f32.mrb[11].mxu1 }
 0x1c5   : > { %v660_v41 = vadd.f32 %v1051_v31, %v659_v40  ;;  %1243 = vmatprep.mubr.msk.f32.mxu0 %vm534_vm1, %v728_v36 }
 0x1c6   : > { %1244 = vmatmul.mubr.msk.f32.vlgmr.msra.gmra.mrb[8].mxu0 %vm534_vm1, %v729_v38  ;;  %v731_v44 = vmax.f32 %v665_v39, 0.0 }
 0x1c7   : > { %v730_v42 = vmax.f32 %v660_v41, 0.0  ;;  %v1211_v43 = vpop.f32.mrb[12].mxu1 }
 0x1c8   : > { %v675_v45 = vadd.f32 %v1211_v43, %v1051_v31  ;;  %v669_v46 = vpop.f32.mrb[13].mxu1 }
 0x1c9   : > { %v670_v47 = vadd.f32 %v1051_v31, %v669_v46  ;;  %1246 = vmatprep.mubr.msk.f32.mxu0 %vm534_vm1, %v730_v42 }
 0x1ca   : > { %1247 = vmatmul.mubr.msk.f32.gmra.mrb[10].mxu0 %vm534_vm1, %v731_v44  ;;  %v733_v50 = vmax.f32 %v675_v45, 0.0 }
 0x1cb   : > { %v732_v48 = vmax.f32 %v670_v47, 0.0  ;;  %v1214_v49 = vpop.f32.mrb[14].mxu1 }
 0x1cc   : > { %v685_v51 = vadd.f32 %v1214_v49, %v1051_v31  ;;  %v679_v52 = vpop.f32.mrb[15].mxu1 }
 0x1cd   : > { %v680_v53 = vadd.f32 %v1051_v31, %v679_v52  ;;  %1249 = vmatprep.mubr.msk.f32.mxu0 %vm534_vm1, %v732_v48 }
 0x1ce   : > { %1250 = vmatmul.mubr.msk.f32.gmra.mrb[12].mxu0 %vm534_vm1, %v733_v50  ;;  %v735_v56 = vmax.f32 %v685_v51, 0.0 }
 0x1cf   : > { %v734_v54 = vmax.f32 %v680_v53, 0.0  ;;  %v1217_v55 = vpop.f32.mrb[16].mxu1 }
 0x1d0   : > { %v695_v57 = vadd.f32 %v1217_v55, %v1051_v31  ;;  %v689_v58 = vpop.f32.mrb[17].mxu1 }
 0x1d1   : > { %v690_v59 = vadd.f32 %v1051_v31, %v689_v58  ;;  %1252 = vmatprep.mubr.msk.f32.mxu0 %vm534_vm1, %v734_v54 }
 0x1d2   : > { %1253 = vmatmul.mubr.msk.f32.gmra.mrb[14].mxu0 %vm534_vm1, %v735_v56  ;;  %v737_v62 = vmax.f32 %v695_v57, 0.0 }
 0x1d3   : > { %v736_v60 = vmax.f32 %v690_v59, 0.0  ;;  %v1220_v61 = vpop.f32.mrb[18].mxu1 }
 0x1d4   : > { %v705_v63 = vadd.f32 %v1220_v61, %v1051_v31  ;;  %v699_v0 = vpop.f32.mrb[19].mxu1 }
 0x1d5   : > { %v700_v1 = vadd.f32 %v1051_v31, %v699_v0  ;;  %1255 = vmatprep.mubr.msk.f32.mxu0 %vm534_vm1, %v736_v60 }
 0x1d6   : > { %1256 = vmatmul.mubr.msk.f32.gmra.mrb[16].mxu0 %vm534_vm1, %v737_v62  ;;  %v739_v4 = vmax.f32 %v705_v63, 0.0 }
 0x1d7   : > { %v738_v2 = vmax.f32 %v700_v1, 0.0  ;;  %v1223_v3 = vpop.f32.mrb[20].mxu1 }
 0x1d8   : > { %v715_v5 = vadd.f32 %v1223_v3, %v1051_v31  ;;  %v709_v6 = vpop.f32.mrb[21].mxu1 }
 0x1d9   : > { %v710_v7 = vadd.f32 %v1051_v31, %v709_v6  ;;  %1258 = vmatprep.mubr.msk.f32.mxu0 %vm534_vm1, %v738_v2 }
 0x1da   : > { %1259 = vmatmul.mubr.msk.f32.gmra.mrb[18].mxu0 %vm534_vm1, %v739_v4  ;;  %v741_v10 = vmax.f32 %v715_v5, 0.0 }
 0x1db   : > { %v740_v8 = vmax.f32 %v710_v7, 0.0  ;;  %v1226_v9 = vpop.f32.mrb[22].mxu1 }
 0x1dc   : > { %v725_v11 = vadd.f32 %v1226_v9, %v1051_v31  ;;  %v719_v12 = vpop.f32.mrb[23].mxu1 }
 0x1dd   : > { %v720_v13 = vadd.f32 %v1051_v31, %v719_v12  ;;  %1261 = vmatprep.mubr.msk.f32.mxu0 %vm534_vm1, %v740_v8 }
 0x1de   : > { %1262 = vmatmul.mubr.msk.f32.gmra.mrb[20].mxu0 %vm534_vm1, %v741_v10  ;;  %v743_v15 = vmax.f32 %v725_v11, 0.0 }
 0x1df   : > { %v742_v14 = vmax.f32 %v720_v13, 0.0 }
 0x1e1   : > { %1264 = vmatprep.mubr.msk.f32.mxu0 %vm534_vm1, %v742_v14 }
 0x1e2   : > { %1265 = vmatmul.mubr.msk.f32.gmra.mrb[22].mxu0 %vm534_vm1, %v743_v15 }
 0x299   : > { %v1245_v17 = vpop.f32.mrb[8].mxu0 }
 0x29a   : > { %v879_v18 = vadd.f32 %v1245_v17, %v1068_v16  ;;  %v873_v19 = vpop.f32.mrb[9].mxu0 }
 0x29b   : > { %v874_v20 = vadd.f32 %v1068_v16, %v873_v19 }
 0x29c   : > { %954 = vst.msk [vmem:[%s1523_s15 + $0x8] sm:$0xff] %vm952_vm2, %v879_v18 }
 0x29d   : > { %953 = vst.msk [vmem:[%s1523_s15] sm:$0xff] %vm952_vm2, %v874_v20  ;;  %v1248_v21 = vpop.f32.mrb[10].mxu0 }
 0x29e   : > { %v889_v22 = vadd.f32 %v1248_v21, %v1068_v16  ;;  %v883_v23 = vpop.f32.mrb[11].mxu0 }
 0x29f   : > { %v884_v24 = vadd.f32 %v1068_v16, %v883_v23 }
 0x2a0   : > { %956 = vst.msk [vmem:[%s1523_s15 + $0x18] sm:$0xff] %vm952_vm2, %v889_v22 }
 0x2a1   : > { %955 = vst.msk [vmem:[%s1523_s15 + $0x10] sm:$0xff] %vm952_vm2, %v884_v24  ;;  %v1251_v25 = vpop.f32.mrb[12].mxu0 }
 0x2a2   : > { %v899_v26 = vadd.f32 %v1251_v25, %v1068_v16  ;;  %v893_v27 = vpop.f32.mrb[13].mxu0 }
 0x2a3   : > { %v894_v28 = vadd.f32 %v1068_v16, %v893_v27 }
 0x2a4   : > { %958 = vst.msk [vmem:[%s1523_s15 + $0x28] sm:$0xff] %vm952_vm2, %v899_v26 }
 0x2a5   : > { %957 = vst.msk [vmem:[%s1523_s15 + $0x20] sm:$0xff] %vm952_vm2, %v894_v28  ;;  %v1254_v29 = vpop.f32.mrb[14].mxu0 }
 0x2a6   : > { %v909_v30 = vadd.f32 %v1254_v29, %v1068_v16  ;;  %v903_v31 = vpop.f32.mrb[15].mxu0 }
 0x2a7   : > { %v904_v32 = vadd.f32 %v1068_v16, %v903_v31 }
 0x2a8   : > { %960 = vst.msk [vmem:[%s1523_s15 + $0x38] sm:$0xff] %vm952_vm2, %v909_v30 }
 0x2a9   : > { %959 = vst.msk [vmem:[%s1523_s15 + $0x30] sm:$0xff] %vm952_vm2, %v904_v32  ;;  %v1257_v33 = vpop.f32.mrb[16].mxu0 }
 0x2aa   : > { %v919_v34 = vadd.f32 %v1257_v33, %v1068_v16  ;;  %v913_v35 = vpop.f32.mrb[17].mxu0 }
 0x2ab   : > { %v914_v36 = vadd.f32 %v1068_v16, %v913_v35 }
 0x2ac   : > { %962 = vst.msk [vmem:[%s1523_s15 + $0x48] sm:$0xff] %vm952_vm2, %v919_v34 }
 0x2ad   : > { %961 = vst.msk [vmem:[%s1523_s15 + $0x40] sm:$0xff] %vm952_vm2, %v914_v36  ;;  %v1260_v37 = vpop.f32.mrb[18].mxu0 }
 0x2ae   : > { %v929_v38 = vadd.f32 %v1260_v37, %v1068_v16  ;;  %v923_v39 = vpop.f32.mrb[19].mxu0 }
 0x2af   : > { %v924_v40 = vadd.f32 %v1068_v16, %v923_v39 }
 0x2b0   : > { %964 = vst.msk [vmem:[%s1523_s15 + $0x58] sm:$0xff] %vm952_vm2, %v929_v38 }
 0x2b1   : > { %963 = vst.msk [vmem:[%s1523_s15 + $0x50] sm:$0xff] %vm952_vm2, %v924_v40  ;;  %v1263_v41 = vpop.f32.mrb[20].mxu0 }
 0x2b2   : > { %v939_v42 = vadd.f32 %v1263_v41, %v1068_v16  ;;  %v933_v43 = vpop.f32.mrb[21].mxu0 }
 0x2b3   : > { %v934_v44 = vadd.f32 %v1068_v16, %v933_v43 }
 0x2b4   : > { %966 = vst.msk [vmem:[%s1523_s15 + $0x68] sm:$0xff] %vm952_vm2, %v939_v42 }
 0x2b5   : > { %965 = vst.msk [vmem:[%s1523_s15 + $0x60] sm:$0xff] %vm952_vm2, %v934_v44  ;;  %v1266_v45 = vpop.f32.mrb[22].mxu0 }
 0x2b6   : > { %v949_v46 = vadd.f32 %v1266_v45, %v1068_v16  ;;  %v943_v47 = vpop.f32.mrb[23].mxu0 }
 0x2b7   : > { %v944_v48 = vadd.f32 %v1068_v16, %v943_v47 }
 0x2b8   : > { %968 = vst.msk [vmem:[%s1523_s15 + $0x78] sm:$0xff] %vm952_vm2, %v949_v46 }
 0x2b9   : > { %967 = vst.msk [vmem:[%s1523_s15 + $0x70] sm:$0xff] %vm952_vm2, %v944_v48 }
 0x2ba PF: > { %s17_s24 = sadd.s32 1, %s1325_s24  }
 0x2bb   : > { %p14_p4 = scmp.ge.s32.totalorder %s17_s24, 6  }
 0x2bd   :  { %16 = sbr.rel (!%p14_p4) target bundleno = 1 (0x1), region = 78 }

</bundles_post_ra>
